<compile_context>
chip_gen: v7x
topology: tpu7x:2x2x1
jax: 0.10.0
libtpu: 0.0.40
codegen_flags: <defaults>
</compile_context>

<pallas_src>
import jax
import jax.numpy as jnp
from jax.experimental import pallas as pl
from jax.experimental.pallas import tpu as pltpu

# ---------------------------------------------------------------------------
# problem sizes (fixed by the module definition)
N_B = 2           # batch
C_IN = 5          # input channels
H_IN = 289        # input height (consumed entirely by the stem conv)
W_IN = 5          # input width  (32 * W_IN == 160 == Linear fan-in)
OUT_DIM = 256
NEG_SLOPE = 0.2

NW = N_B * W_IN            # 10 real rows, row r = w*N_B + n
NWP = 16                   # rows padded to a multiple of 8
K_IN = C_IN * H_IN         # 1445  (stem contraction dim)
K_PAD = 1536               # padded to a multiple of 128

C1 = 16                    # stem output channels
E1 = 64                    # block-1 expansion channels (== block-1 output)
E2 = 256                   # block-2 expansion channels
C3 = 32                    # block-2 output channels

# row offsets inside the packed (R_TOT, 256) bf16 weight slab
R_P1A, R_P1B, R_SC, R_P2B, R_LIN = 0, 16, 80, 144, 400
R_B0, R_BP1A, R_BD1, R_BP1B = 560, 561, 562, 563
R_BD2, R_BP2B, R_BSC, R_BLIN = 564, 565, 566, 567
R_WD1, R_WD2 = 568, 571
R_TOT = 576


def _leaky(v):
    return jnp.where(v >= 0, v, NEG_SLOPE * v)


def _dwconv_w(y, wd, bd, valid):
    """Depthwise (1,3) conv along w (rows ordered r = w*N_B + n), zero pad 1.

    y     : (NWP, C) f32 activations (pad rows may hold garbage)
    wd    : (3, C)   taps, wd[k, c] = torch_weight[c, 0, 0, k]
    bd    : (1, C)   bias
    valid : (NWP, 1) f32, 1.0 on the NW real rows, 0.0 on pad rows
    """
    y = y * valid                                   # keep pad rows at zero
    zero = jnp.zeros((N_B, y.shape[1]), jnp.float32)
    y_prev = jnp.concatenate([zero, y[:-N_B, :]], axis=0)   # row r -> y[r - N_B]
    y_next = jnp.concatenate([y[N_B:, :], zero], axis=0)    # row r -> y[r + N_B]
    return y_prev * wd[0:1, :] + y * wd[1:2, :] + y_next * wd[2:3, :] + bd


def _vinverted_kernel(x_ref, w0_ref, ws_ref, o_ref):
    f32, bf16 = jnp.float32, jnp.bfloat16

    row = jax.lax.broadcasted_iota(jnp.int32, (NWP, 1), 0)
    valid = (row < NW).astype(f32)

    # ---- stem: Conv2d(5 -> 16, kernel (289,1)) + LeakyReLU -------------------
    h = jnp.dot(x_ref[...], w0_ref[...], preferred_element_type=f32)
    h = _leaky(h + ws_ref[R_B0:R_B0 + 1, :C1])                       # (NWP, 16)

    # ---- block 1: expand 16->64, depthwise (1,3), LeakyReLUs -----------------
    y = jnp.dot(h.astype(bf16), ws_ref[R_P1A:R_P1A + C1, :E1],
                preferred_element_type=f32)
    y = _leaky(y + ws_ref[R_BP1A:R_BP1A + 1, :E1])                   # (NWP, 64)
    y = _leaky(_dwconv_w(y, ws_ref[R_WD1:R_WD1 + 3, :E1],
                         ws_ref[R_BD1:R_BD1 + 1, :E1], valid))       # (NWP, 64)

    # ---- block 1 projection folded (on host) into block-2 expand + shortcut --
    yb = y.astype(bf16)
    z = jnp.dot(yb, ws_ref[R_P1B:R_P1B + E1, :E2], preferred_element_type=f32)
    z = _leaky(z + ws_ref[R_BP1B:R_BP1B + 1, :E2])                   # (NWP, 256)
    sc = jnp.dot(yb, ws_ref[R_SC:R_SC + E1, :C3], preferred_element_type=f32)
    sc = sc + ws_ref[R_BSC:R_BSC + 1, :C3]                           # (NWP, 32)

    # ---- block 2: depthwise (1,3), project 256->32, add shortcut -------------
    z = _leaky(_dwconv_w(z, ws_ref[R_WD2:R_WD2 + 3, :E2],
                         ws_ref[R_BD2:R_BD2 + 1, :E2], valid))       # (NWP, 256)
    body = jnp.dot(z.astype(bf16), ws_ref[R_P2B:R_P2B + E2, :C3],
                   preferred_element_type=f32)
    out2 = body + ws_ref[R_BP2B:R_BP2B + 1, :C3] + sc                # (NWP, 32)

    # ---- Flatten (NCHW order) + Linear(32*W -> 256) ---------------------------
    # out[n, :] = b_lin + sum_w out2[w*N_B + n, :] @ WLV[w*32:(w+1)*32, :]
    # (5 independent K=32 dots over contiguous static row slices; no sel matmuls)
    acc = jnp.zeros((N_B, OUT_DIM), f32)
    for w in range(W_IN):
        xw = out2[w * N_B:(w + 1) * N_B, :].astype(bf16)             # (N_B, 32)
        wl = ws_ref[R_LIN + w * C3:R_LIN + (w + 1) * C3, :]          # (32, 256)
        acc = acc + jnp.dot(xw, wl, preferred_element_type=f32)
    o_ref[...] = acc + ws_ref[R_BLIN:R_BLIN + 1, :]


# ---------------------------------------------------------------------------
# parameter initialization (PyTorch-shaped) and host-side packing
def init_params(key):
    keys = iter(jax.random.split(key, 24))

    def conv_w(shape):
        fan_in = shape[1] * shape[2] * shape[3]
        return jax.random.normal(next(keys), shape, jnp.float32) / jnp.sqrt(fan_in)

    def bias(n):
        return 0.01 * jax.random.normal(next(keys), (n,), jnp.float32)

    p = {}
    p["w0"], p["b0"] = conv_w((16, C_IN, H_IN, 1)), bias(16)
    # block 1: 16 -> 64, expansion 4, stride (2, 1)  (no shortcut)
    p["w_pw1a"], p["b_pw1a"] = conv_w((64, 16, 1, 1)), bias(64)
    p["w_dw1"], p["b_dw1"] = conv_w((64, 1, 1, 3)), bias(64)
    p["w_pw2a"], p["b_pw2a"] = conv_w((64, 64, 1, 1)), bias(64)
    # block 2: 64 -> 32, expansion 4, stride (1, 1)  (with shortcut)
    p["w_pw1b"], p["b_pw1b"] = conv_w((256, 64, 1, 1)), bias(256)
    p["w_dw2"], p["b_dw2"] = conv_w((256, 1, 1, 3)), bias(256)
    p["w_pw2b"], p["b_pw2b"] = conv_w((32, 256, 1, 1)), bias(32)
    p["w_sc"], p["b_sc"] = conv_w((32, 64, 1, 1)), bias(32)
    # final linear: 32 * W_IN -> OUT_DIM
    p["w_lin"] = jax.random.normal(next(keys), (OUT_DIM, 32 * W_IN),
                                   jnp.float32) / jnp.sqrt(32 * W_IN)
    p["b_lin"] = bias(OUT_DIM)
    return p


def pack_params(p):
    """One-time host packing: fold w_pw2a into block-2, build bf16 weight slab."""
    f32 = jnp.float32

    def pw(wt):   # (Co, Ci, 1, 1) -> (Ci, Co)
        return wt[:, :, 0, 0].T.astype(f32)

    def dwt(wt):  # (C, 1, 1, 3) -> (3, C)
        return wt[:, 0, 0, :].T.astype(f32)

    def row(bv):
        return bv.reshape(1, -1).astype(f32)

    # stem weight: (16, C, H, 1) -> (C*H, 16), contraction dim padded to K_PAD
    w0 = p["w0"][:, :, :, 0].transpose(1, 2, 0).reshape(K_IN, C1)
    w0 = jnp.pad(w0, ((0, K_PAD - K_IN), (0, 0))).astype(jnp.bfloat16)

    # fold block-1 projection (w_pw2a) into block-2 expand + shortcut (exact:
    # there is no activation between them)
    p2a, b2a = pw(p["w_pw2a"]), row(p["b_pw2a"])
    p1b, b1b = pw(p["w_pw1b"]), row(p["b_pw1b"])
    psc, bsc = pw(p["w_sc"]), row(p["b_sc"])
    w1b_f = p2a @ p1b                      # (64, 256)
    b1b_f = b2a @ p1b + b1b                # (1, 256)
    wsc_f = p2a @ psc                      # (64, 32)
    bsc_f = b2a @ psc + bsc                # (1, 32)

    # final linear re-laid per w-position: wlv[w*32 + c, o] = W_lin[o, c*W + w]
    wlv = p["w_lin"].reshape(OUT_DIM, C3, W_IN).transpose(2, 1, 0)
    wlv = wlv.reshape(C3 * W_IN, OUT_DIM)

    ws = jnp.zeros((R_TOT, OUT_DIM), f32)

    def put(buf, r, m):
        return buf.at[r:r + m.shape[0], :m.shape[1]].set(m)

    ws = put(ws, R_P1A, pw(p["w_pw1a"]))
    ws = put(ws, R_P1B, w1b_f)
    ws = put(ws, R_SC, wsc_f)
    ws = put(ws, R_P2B, pw(p["w_pw2b"]))
    ws = put(ws, R_LIN, wlv)
    ws = put(ws, R_B0, row(p["b0"]))
    ws = put(ws, R_BP1A, row(p["b_pw1a"]))
    ws = put(ws, R_BD1, row(p["b_dw1"]))
    ws = put(ws, R_BP1B, b1b_f)
    ws = put(ws, R_BD2, row(p["b_dw2"]))
    ws = put(ws, R_BP2B, row(p["b_pw2b"]))
    ws = put(ws, R_BSC, bsc_f)
    ws = put(ws, R_BLIN, row(p["b_lin"]))
    ws = put(ws, R_WD1, dwt(p["w_dw1"]))
    ws = put(ws, R_WD2, dwt(p["w_dw2"]))
    return {"w0": w0, "wslab": ws.astype(jnp.bfloat16)}


def vinverted_residual_forward(x, packed):
    n, c, h, w = x.shape
    assert (n, c, h, w) == (N_B, C_IN, H_IN, W_IN), x.shape

    # rows r = w*N_B + n, cols = (ci, h) flattened; pad rows -> NWP, K -> K_PAD
    x_mat = x.transpose(3, 0, 1, 2).reshape(n * w, c * h)
    x_mat = jnp.pad(x_mat, ((0, NWP - n * w), (0, K_PAD - c * h)))
    x_mat = x_mat.astype(jnp.bfloat16)

    vmem = pl.BlockSpec(memory_space=pltpu.MemorySpace.VMEM)
    return pl.pallas_call(
        _vinverted_kernel,
        out_shape=jax.ShapeDtypeStruct((n, OUT_DIM), jnp.float32),
        in_specs=[vmem, vmem, vmem],
        out_specs=vmem,
    )(x_mat, packed["w0"], packed["wslab"])


# ---------------------------------------------------------------------------
def reference_forward(x, p):
    """Pure-JAX NCHW reference mirroring the PyTorch module exactly (f32)."""
    def leaky(v):
        return jnp.where(v >= 0, v, NEG_SLOPE * v)

    def conv1x1(t, wt, bv):
        return jnp.einsum("nchw,oc->nohw", t, wt[:, :, 0, 0]) + bv[None, :, None, None]

    def dwconv13(t, wt, bv):
        # kernel (1,3), padding (0,1), stride 1 along W (H stride irrelevant, H==1)
        ww = t.shape[3]
        tp = jnp.pad(t, ((0, 0), (0, 0), (0, 0), (1, 1)))
        out = bv[None, :, None, None]
        for kk in range(3):
            out = out + tp[:, :, :, kk:kk + ww] * wt[:, 0, 0, kk][None, :, None, None]
        return out

    with jax.default_matmul_precision("highest"):
        # stem: Conv2d(5->16, (289,1)) + LeakyReLU
        h = jnp.einsum("nchw,och->now", x, p["w0"][:, :, :, 0])[:, :, None, :]
        h = leaky(h + p["b0"][None, :, None, None])
        # block 1 (no shortcut)
        y = leaky(conv1x1(h, p["w_pw1a"], p["b_pw1a"]))
        y = leaky(dwconv13(y, p["w_dw1"], p["b_dw1"]))
        x1 = conv1x1(y, p["w_pw2a"], p["b_pw2a"])
        # block 2 (with shortcut)
        y = leaky(conv1x1(x1, p["w_pw1b"], p["b_pw1b"]))
        y = leaky(dwconv13(y, p["w_dw2"], p["b_dw2"]))
        out = conv1x1(y, p["w_pw2b"], p["b_pw2b"]) + conv1x1(x1, p["w_sc"], p["b_sc"])
        # Flatten + Linear
        flat = out.reshape(out.shape[0], -1)
        return flat @ p["w_lin"].T + p["b_lin"][None, :]


if __name__ == "__main__":
    key = jax.random.PRNGKey(0)
    kx, kp = jax.random.split(key)
    x = jax.random.normal(kx, (N_B, C_IN, H_IN, W_IN), jnp.float32)
    params = init_params(kp)
    packed = pack_params(params)

    out = jax.block_until_ready(vinverted_residual_forward(x, packed))
    assert out.shape == (N_B, OUT_DIM), out.shape

    ref = reference_forward(x, params)
    # kernel uses bf16 MXU operands with f32 accumulation vs an f32 "highest"
    # precision reference -> tolerance-based comparison.
    if jnp.allclose(out, ref, atol=3e-2, rtol=3e-2):
        print("KERNEL_OK")
    else:
        print("MISMATCH max_abs_err=", float(jnp.max(jnp.abs(out - ref))))
</pallas_src>

<mosaic_0001>
module attributes {stable_mosaic.version = 11 : i64} {
  func.func @_vinverted_kernel(%arg0: memref<16x1536xbf16, #tpu.memory_space<vmem>>, %arg1: memref<1536x16xbf16, #tpu.memory_space<vmem>>, %arg2: memref<576x256xbf16, #tpu.memory_space<vmem>>, %arg3: memref<2x256xf32, #tpu.memory_space<vmem>>) attributes {dimension_semantics = [], scalar_prefetch = 0 : i64, scratch_operands = 0 : i64, tpu.core_type = #tpu.core_type<tc>} {
    %0 = tpu.iota {dimensions = array<i32: 0>} : vector<16x1xi32>
    %c10_i32 = arith.constant 10 : i32
    %1 = vector.broadcast %c10_i32 : i32 to vector<16x1xi32>
    %2 = arith.cmpi slt, %0, %1 : vector<16x1xi32>
    %3 = arith.extui %2 : vector<16x1xi1> to vector<16x1xi32>
    %4 = arith.sitofp %3 : vector<16x1xi32> to vector<16x1xf32>
    %c0 = arith.constant 0 : index
    %c0_0 = arith.constant 0 : index
    %5 = vector.load %arg0[%c0, %c0_0] : memref<16x1536xbf16, #tpu.memory_space<vmem>>, vector<16x1536xbf16>
    %c0_1 = arith.constant 0 : index
    %c0_2 = arith.constant 0 : index
    %6 = vector.load %arg1[%c0_1, %c0_2] : memref<1536x16xbf16, #tpu.memory_space<vmem>>, vector<1536x16xbf16>
    %cst = arith.constant dense<0.000000e+00> : vector<16x16xf32>
    %7 = tpu.matmul %5, %6, %cst {dimension_numbers = #tpu.dot_dimension_numbers<[1], [0], [0], [1], [0, 0, 1, 1], [], []>} : vector<16x1536xbf16>, vector<1536x16xbf16>, vector<16x16xf32> -> vector<16x16xf32>
    %c560 = arith.constant 560 : index
    %c0_3 = arith.constant 0 : index
    %8 = vector.load %arg2[%c560, %c0_3] : memref<576x256xbf16, #tpu.memory_space<vmem>>, vector<1x16xbf16>
    %9 = arith.extf %8 : vector<1x16xbf16> to vector<1x16xf32>
    %10 = vector.broadcast %9 : vector<1x16xf32> to vector<16x16xf32>
    %11 = arith.addf %7, %10 : vector<16x16xf32>
    %cst_4 = arith.constant 0.000000e+00 : f32
    %12 = vector.broadcast %cst_4 : f32 to vector<16x16xf32>
    %13 = arith.cmpf oge, %11, %12 : vector<16x16xf32>
    %cst_5 = arith.constant 2.000000e-01 : f32
    %14 = vector.broadcast %cst_5 : f32 to vector<16x16xf32>
    %15 = arith.mulf %14, %11 : vector<16x16xf32>
    %16 = arith.select %13, %11, %15 : vector<16x16xi1>, vector<16x16xf32>
    %17 = arith.truncf %16 : vector<16x16xf32> to vector<16x16xbf16>
    %c0_6 = arith.constant 0 : index
    %c0_7 = arith.constant 0 : index
    %18 = vector.load %arg2[%c0_6, %c0_7] : memref<576x256xbf16, #tpu.memory_space<vmem>>, vector<16x64xbf16>
    %cst_8 = arith.constant dense<0.000000e+00> : vector<16x64xf32>
    %19 = tpu.matmul %17, %18, %cst_8 {dimension_numbers = #tpu.dot_dimension_numbers<[1], [0], [0], [1], [0, 0, 1, 1], [], []>} : vector<16x16xbf16>, vector<16x64xbf16>, vector<16x64xf32> -> vector<16x64xf32>
    %c561 = arith.constant 561 : index
    %c0_9 = arith.constant 0 : index
    %20 = vector.load %arg2[%c561, %c0_9] : memref<576x256xbf16, #tpu.memory_space<vmem>>, vector<1x64xbf16>
    %21 = arith.extf %20 : vector<1x64xbf16> to vector<1x64xf32>
    %22 = vector.broadcast %21 : vector<1x64xf32> to vector<16x64xf32>
    %23 = arith.addf %19, %22 : vector<16x64xf32>
    %cst_10 = arith.constant 0.000000e+00 : f32
    %24 = vector.broadcast %cst_10 : f32 to vector<16x64xf32>
    %25 = arith.cmpf oge, %23, %24 : vector<16x64xf32>
    %cst_11 = arith.constant 2.000000e-01 : f32
    %26 = vector.broadcast %cst_11 : f32 to vector<16x64xf32>
    %27 = arith.mulf %26, %23 : vector<16x64xf32>
    %28 = arith.select %25, %23, %27 : vector<16x64xi1>, vector<16x64xf32>
    %c568 = arith.constant 568 : index
    %c0_12 = arith.constant 0 : index
    %29 = vector.load %arg2[%c568, %c0_12] : memref<576x256xbf16, #tpu.memory_space<vmem>>, vector<3x64xbf16>
    %c562 = arith.constant 562 : index
    %c0_13 = arith.constant 0 : index
    %30 = vector.load %arg2[%c562, %c0_13] : memref<576x256xbf16, #tpu.memory_space<vmem>>, vector<1x64xbf16>
    %31 = vector.broadcast %4 : vector<16x1xf32> to vector<16x64xf32>
    %32 = arith.mulf %28, %31 : vector<16x64xf32>
    %cst_14 = arith.constant 0.000000e+00 : f32
    %33 = vector.broadcast %cst_14 : f32 to vector<2x64xf32>
    %34 = vector.extract_strided_slice %32 {offsets = [0, 0], sizes = [14, 64], strides = [1, 1]} : vector<16x64xf32> to vector<14x64xf32>
    %35 = tpu.concatenate %33, %34 in 0 : vector<2x64xf32>, vector<14x64xf32> -> vector<16x64xf32>
    %36 = vector.extract_strided_slice %32 {offsets = [2, 0], sizes = [14, 64], strides = [1, 1]} : vector<16x64xf32> to vector<14x64xf32>
    %37 = tpu.concatenate %36, %33 in 0 : vector<14x64xf32>, vector<2x64xf32> -> vector<16x64xf32>
    %38 = vector.extract_strided_slice %29 {offsets = [0, 0], sizes = [1, 64], strides = [1, 1]} : vector<3x64xbf16> to vector<1x64xbf16>
    %39 = arith.extf %38 : vector<1x64xbf16> to vector<1x64xf32>
    %40 = vector.broadcast %39 : vector<1x64xf32> to vector<16x64xf32>
    %41 = arith.mulf %35, %40 : vector<16x64xf32>
    %42 = vector.extract_strided_slice %29 {offsets = [1, 0], sizes = [1, 64], strides = [1, 1]} : vector<3x64xbf16> to vector<1x64xbf16>
    %43 = arith.extf %42 : vector<1x64xbf16> to vector<1x64xf32>
    %44 = vector.broadcast %43 : vector<1x64xf32> to vector<16x64xf32>
    %45 = arith.mulf %32, %44 : vector<16x64xf32>
    %46 = arith.addf %41, %45 : vector<16x64xf32>
    %47 = vector.extract_strided_slice %29 {offsets = [2, 0], sizes = [1, 64], strides = [1, 1]} : vector<3x64xbf16> to vector<1x64xbf16>
    %48 = arith.extf %47 : vector<1x64xbf16> to vector<1x64xf32>
    %49 = vector.broadcast %48 : vector<1x64xf32> to vector<16x64xf32>
    %50 = arith.mulf %37, %49 : vector<16x64xf32>
    %51 = arith.addf %46, %50 : vector<16x64xf32>
    %52 = arith.extf %30 : vector<1x64xbf16> to vector<1x64xf32>
    %53 = vector.broadcast %52 : vector<1x64xf32> to vector<16x64xf32>
    %54 = arith.addf %51, %53 : vector<16x64xf32>
    %cst_15 = arith.constant 0.000000e+00 : f32
    %55 = vector.broadcast %cst_15 : f32 to vector<16x64xf32>
    %56 = arith.cmpf oge, %54, %55 : vector<16x64xf32>
    %cst_16 = arith.constant 2.000000e-01 : f32
    %57 = vector.broadcast %cst_16 : f32 to vector<16x64xf32>
    %58 = arith.mulf %57, %54 : vector<16x64xf32>
    %59 = arith.select %56, %54, %58 : vector<16x64xi1>, vector<16x64xf32>
    %60 = arith.truncf %59 : vector<16x64xf32> to vector<16x64xbf16>
    %c16 = arith.constant 16 : index
    %c0_17 = arith.constant 0 : index
    %61 = vector.load %arg2[%c16, %c0_17] : memref<576x256xbf16, #tpu.memory_space<vmem>>, vector<64x256xbf16>
    %cst_18 = arith.constant dense<0.000000e+00> : vector<16x256xf32>
    %62 = tpu.matmul %60, %61, %cst_18 {dimension_numbers = #tpu.dot_dimension_numbers<[1], [0], [0], [1], [0, 0, 1, 1], [], []>} : vector<16x64xbf16>, vector<64x256xbf16>, vector<16x256xf32> -> vector<16x256xf32>
    %c563 = arith.constant 563 : index
    %c0_19 = arith.constant 0 : index
    %63 = vector.load %arg2[%c563, %c0_19] : memref<576x256xbf16, #tpu.memory_space<vmem>>, vector<1x256xbf16>
    %64 = arith.extf %63 : vector<1x256xbf16> to vector<1x256xf32>
    %65 = vector.broadcast %64 : vector<1x256xf32> to vector<16x256xf32>
    %66 = arith.addf %62, %65 : vector<16x256xf32>
    %cst_20 = arith.constant 0.000000e+00 : f32
    %67 = vector.broadcast %cst_20 : f32 to vector<16x256xf32>
    %68 = arith.cmpf oge, %66, %67 : vector<16x256xf32>
    %cst_21 = arith.constant 2.000000e-01 : f32
    %69 = vector.broadcast %cst_21 : f32 to vector<16x256xf32>
    %70 = arith.mulf %69, %66 : vector<16x256xf32>
    %71 = arith.select %68, %66, %70 : vector<16x256xi1>, vector<16x256xf32>
    %c80 = arith.constant 80 : index
    %c0_22 = arith.constant 0 : index
    %72 = vector.load %arg2[%c80, %c0_22] : memref<576x256xbf16, #tpu.memory_space<vmem>>, vector<64x32xbf16>
    %cst_23 = arith.constant dense<0.000000e+00> : vector<16x32xf32>
    %73 = tpu.matmul %60, %72, %cst_23 {dimension_numbers = #tpu.dot_dimension_numbers<[1], [0], [0], [1], [0, 0, 1, 1], [], []>} : vector<16x64xbf16>, vector<64x32xbf16>, vector<16x32xf32> -> vector<16x32xf32>
    %c566 = arith.constant 566 : index
    %c0_24 = arith.constant 0 : index
    %74 = vector.load %arg2[%c566, %c0_24] : memref<576x256xbf16, #tpu.memory_space<vmem>>, vector<1x32xbf16>
    %75 = arith.extf %74 : vector<1x32xbf16> to vector<1x32xf32>
    %76 = vector.broadcast %75 : vector<1x32xf32> to vector<16x32xf32>
    %77 = arith.addf %73, %76 : vector<16x32xf32>
    %c571 = arith.constant 571 : index
    %c0_25 = arith.constant 0 : index
    %78 = vector.load %arg2[%c571, %c0_25] : memref<576x256xbf16, #tpu.memory_space<vmem>>, vector<3x256xbf16>
    %c564 = arith.constant 564 : index
    %c0_26 = arith.constant 0 : index
    %79 = vector.load %arg2[%c564, %c0_26] : memref<576x256xbf16, #tpu.memory_space<vmem>>, vector<1x256xbf16>
    %80 = vector.broadcast %4 : vector<16x1xf32> to vector<16x256xf32>
    %81 = arith.mulf %71, %80 : vector<16x256xf32>
    %cst_27 = arith.constant 0.000000e+00 : f32
    %82 = vector.broadcast %cst_27 : f32 to vector<2x256xf32>
    %83 = vector.extract_strided_slice %81 {offsets = [0, 0], sizes = [14, 256], strides = [1, 1]} : vector<16x256xf32> to vector<14x256xf32>
    %84 = tpu.concatenate %82, %83 in 0 : vector<2x256xf32>, vector<14x256xf32> -> vector<16x256xf32>
    %85 = vector.extract_strided_slice %81 {offsets = [2, 0], sizes = [14, 256], strides = [1, 1]} : vector<16x256xf32> to vector<14x256xf32>
    %86 = tpu.concatenate %85, %82 in 0 : vector<14x256xf32>, vector<2x256xf32> -> vector<16x256xf32>
    %87 = vector.extract_strided_slice %78 {offsets = [0, 0], sizes = [1, 256], strides = [1, 1]} : vector<3x256xbf16> to vector<1x256xbf16>
    %88 = arith.extf %87 : vector<1x256xbf16> to vector<1x256xf32>
    %89 = vector.broadcast %88 : vector<1x256xf32> to vector<16x256xf32>
    %90 = arith.mulf %84, %89 : vector<16x256xf32>
    %91 = vector.extract_strided_slice %78 {offsets = [1, 0], sizes = [1, 256], strides = [1, 1]} : vector<3x256xbf16> to vector<1x256xbf16>
    %92 = arith.extf %91 : vector<1x256xbf16> to vector<1x256xf32>
    %93 = vector.broadcast %92 : vector<1x256xf32> to vector<16x256xf32>
    %94 = arith.mulf %81, %93 : vector<16x256xf32>
    %95 = arith.addf %90, %94 : vector<16x256xf32>
    %96 = vector.extract_strided_slice %78 {offsets = [2, 0], sizes = [1, 256], strides = [1, 1]} : vector<3x256xbf16> to vector<1x256xbf16>
    %97 = arith.extf %96 : vector<1x256xbf16> to vector<1x256xf32>
    %98 = vector.broadcast %97 : vector<1x256xf32> to vector<16x256xf32>
    %99 = arith.mulf %86, %98 : vector<16x256xf32>
    %100 = arith.addf %95, %99 : vector<16x256xf32>
    %101 = arith.extf %79 : vector<1x256xbf16> to vector<1x256xf32>
    %102 = vector.broadcast %101 : vector<1x256xf32> to vector<16x256xf32>
    %103 = arith.addf %100, %102 : vector<16x256xf32>
    %cst_28 = arith.constant 0.000000e+00 : f32
    %104 = vector.broadcast %cst_28 : f32 to vector<16x256xf32>
    %105 = arith.cmpf oge, %103, %104 : vector<16x256xf32>
    %cst_29 = arith.constant 2.000000e-01 : f32
    %106 = vector.broadcast %cst_29 : f32 to vector<16x256xf32>
    %107 = arith.mulf %106, %103 : vector<16x256xf32>
    %108 = arith.select %105, %103, %107 : vector<16x256xi1>, vector<16x256xf32>
    %109 = arith.truncf %108 : vector<16x256xf32> to vector<16x256xbf16>
    %c144 = arith.constant 144 : index
    %c0_30 = arith.constant 0 : index
    %110 = vector.load %arg2[%c144, %c0_30] : memref<576x256xbf16, #tpu.memory_space<vmem>>, vector<256x32xbf16>
    %cst_31 = arith.constant dense<0.000000e+00> : vector<16x32xf32>
    %111 = tpu.matmul %109, %110, %cst_31 {dimension_numbers = #tpu.dot_dimension_numbers<[1], [0], [0], [1], [0, 0, 1, 1], [], []>} : vector<16x256xbf16>, vector<256x32xbf16>, vector<16x32xf32> -> vector<16x32xf32>
    %c565 = arith.constant 565 : index
    %c0_32 = arith.constant 0 : index
    %112 = vector.load %arg2[%c565, %c0_32] : memref<576x256xbf16, #tpu.memory_space<vmem>>, vector<1x32xbf16>
    %113 = arith.extf %112 : vector<1x32xbf16> to vector<1x32xf32>
    %114 = vector.broadcast %113 : vector<1x32xf32> to vector<16x32xf32>
    %115 = arith.addf %111, %114 : vector<16x32xf32>
    %116 = arith.addf %115, %77 : vector<16x32xf32>
    %cst_33 = arith.constant 0.000000e+00 : f32
    %117 = vector.broadcast %cst_33 : f32 to vector<2x256xf32>
    %118 = vector.extract_strided_slice %116 {offsets = [0, 0], sizes = [2, 32], strides = [1, 1]} : vector<16x32xf32> to vector<2x32xf32>
    %119 = arith.truncf %118 : vector<2x32xf32> to vector<2x32xbf16>
    %c400 = arith.constant 400 : index
    %c0_34 = arith.constant 0 : index
    %120 = vector.load %arg2[%c400, %c0_34] : memref<576x256xbf16, #tpu.memory_space<vmem>>, vector<32x256xbf16>
    %cst_35 = arith.constant dense<0.000000e+00> : vector<2x256xf32>
    %121 = tpu.matmul %119, %120, %cst_35 {dimension_numbers = #tpu.dot_dimension_numbers<[1], [0], [0], [1], [0, 0, 1, 1], [], []>} : vector<2x32xbf16>, vector<32x256xbf16>, vector<2x256xf32> -> vector<2x256xf32>
    %122 = arith.addf %117, %121 : vector<2x256xf32>
    %123 = vector.extract_strided_slice %116 {offsets = [2, 0], sizes = [2, 32], strides = [1, 1]} : vector<16x32xf32> to vector<2x32xf32>
    %124 = arith.truncf %123 : vector<2x32xf32> to vector<2x32xbf16>
    %c432 = arith.constant 432 : index
    %c0_36 = arith.constant 0 : index
    %125 = vector.load %arg2[%c432, %c0_36] : memref<576x256xbf16, #tpu.memory_space<vmem>>, vector<32x256xbf16>
    %cst_37 = arith.constant dense<0.000000e+00> : vector<2x256xf32>
    %126 = tpu.matmul %124, %125, %cst_37 {dimension_numbers = #tpu.dot_dimension_numbers<[1], [0], [0], [1], [0, 0, 1, 1], [], []>} : vector<2x32xbf16>, vector<32x256xbf16>, vector<2x256xf32> -> vector<2x256xf32>
    %127 = arith.addf %122, %126 : vector<2x256xf32>
    %128 = vector.extract_strided_slice %116 {offsets = [4, 0], sizes = [2, 32], strides = [1, 1]} : vector<16x32xf32> to vector<2x32xf32>
    %129 = arith.truncf %128 : vector<2x32xf32> to vector<2x32xbf16>
    %c464 = arith.constant 464 : index
    %c0_38 = arith.constant 0 : index
    %130 = vector.load %arg2[%c464, %c0_38] : memref<576x256xbf16, #tpu.memory_space<vmem>>, vector<32x256xbf16>
    %cst_39 = arith.constant dense<0.000000e+00> : vector<2x256xf32>
    %131 = tpu.matmul %129, %130, %cst_39 {dimension_numbers = #tpu.dot_dimension_numbers<[1], [0], [0], [1], [0, 0, 1, 1], [], []>} : vector<2x32xbf16>, vector<32x256xbf16>, vector<2x256xf32> -> vector<2x256xf32>
    %132 = arith.addf %127, %131 : vector<2x256xf32>
    %133 = vector.extract_strided_slice %116 {offsets = [6, 0], sizes = [2, 32], strides = [1, 1]} : vector<16x32xf32> to vector<2x32xf32>
    %134 = arith.truncf %133 : vector<2x32xf32> to vector<2x32xbf16>
    %c496 = arith.constant 496 : index
    %c0_40 = arith.constant 0 : index
    %135 = vector.load %arg2[%c496, %c0_40] : memref<576x256xbf16, #tpu.memory_space<vmem>>, vector<32x256xbf16>
    %cst_41 = arith.constant dense<0.000000e+00> : vector<2x256xf32>
    %136 = tpu.matmul %134, %135, %cst_41 {dimension_numbers = #tpu.dot_dimension_numbers<[1], [0], [0], [1], [0, 0, 1, 1], [], []>} : vector<2x32xbf16>, vector<32x256xbf16>, vector<2x256xf32> -> vector<2x256xf32>
    %137 = arith.addf %132, %136 : vector<2x256xf32>
    %138 = vector.extract_strided_slice %116 {offsets = [8, 0], sizes = [2, 32], strides = [1, 1]} : vector<16x32xf32> to vector<2x32xf32>
    %139 = arith.truncf %138 : vector<2x32xf32> to vector<2x32xbf16>
    %c528 = arith.constant 528 : index
    %c0_42 = arith.constant 0 : index
    %140 = vector.load %arg2[%c528, %c0_42] : memref<576x256xbf16, #tpu.memory_space<vmem>>, vector<32x256xbf16>
    %cst_43 = arith.constant dense<0.000000e+00> : vector<2x256xf32>
    %141 = tpu.matmul %139, %140, %cst_43 {dimension_numbers = #tpu.dot_dimension_numbers<[1], [0], [0], [1], [0, 0, 1, 1], [], []>} : vector<2x32xbf16>, vector<32x256xbf16>, vector<2x256xf32> -> vector<2x256xf32>
    %142 = arith.addf %137, %141 : vector<2x256xf32>
    %c567 = arith.constant 567 : index
    %c0_44 = arith.constant 0 : index
    %143 = vector.load %arg2[%c567, %c0_44] : memref<576x256xbf16, #tpu.memory_space<vmem>>, vector<1x256xbf16>
    %144 = arith.extf %143 : vector<1x256xbf16> to vector<1x256xf32>
    %145 = vector.broadcast %144 : vector<1x256xf32> to vector<2x256xf32>
    %146 = arith.addf %142, %145 : vector<2x256xf32>
    %c0_45 = arith.constant 0 : index
    %c0_46 = arith.constant 0 : index
    %147 = vector.load %arg3[%c0_45, %c0_46] : memref<2x256xf32, #tpu.memory_space<vmem>>, vector<2x256xf32>
    tpu.vector_store %arg3[%c0_45, %c0_46], %146 {strides = array<i32>} : memref<2x256xf32, #tpu.memory_space<vmem>>, vector<2x256xf32>,
    return
  }
}

</mosaic_0001>

<bundles_post_ra>
// kernel: tpu_custom_call.1
= control target key start
LH: loop header
LB: loop body
LE: loop exit
PB: predicated region body
PF: predicated region fallthrough
CT: control target
= control target key end

     0   :  { %s3274_s0 = inlined_call_operand.vmem [shape: bf16[16,1536], index: 0, kind: input, shape index: {}]   ;;  %s3275_s1 = inlined_call_operand.vmem [shape: bf16[1536,16], index: 1, kind: input, shape index: {}]   ;;  %s3276_s2 = inlined_call_operand.vmem [shape: bf16[576,256], index: 2, kind: input, shape index: {}]   ;;  %s3277_s3 = inlined_call_operand.hbm [shape: f32[2,256], index: 3, kind: output, shape index: {}]  }
   0x1   :  { %v2468_v0 = vld [vmem:[%s3275_s1 + $0x40] sm:$0xff]   ;;  %v2472_v4 = vld [vmem:[%s3275_s1 + $0x48] sm:$0xff]   ;;  %v2476_v8 = vld [vmem:[%s3275_s1 + $0x50] sm:$0xff]  }
   0x2   :  { %v2469_v1 = vld [vmem:[%s3275_s1 + $0xc0] sm:$0xff]   ;;  %2285 = vmatprep.subr.bf16.mxu0 %v2468_v0  ;;  %v2473_v5 = vld [vmem:[%s3275_s1 + $0xc8] sm:$0xff]   ;;  %v2477_v9 = vld [vmem:[%s3275_s1 + $0xd0] sm:$0xff]  }
   0x3   :  { %v2470_v2 = vld [vmem:[%s3275_s1] sm:$0xff]   ;;  %2307 = vmatprep.subr.bf16.mxu1 %v2469_v1  ;;  %v2474_v6 = vld [vmem:[%s3275_s1 + $0x8] sm:$0xff]   ;;  %v2478_v10 = vld [vmem:[%s3275_s1 + $0x10] sm:$0xff]  }
   0x4   :  { %v2471_v3 = vld [vmem:[%s3275_s1 + $0x80] sm:$0xff]   ;;  %2286 = vmatpush3.bf16.msra.mxu0 %v2470_v2  ;;  %v2475_v7 = vld [vmem:[%s3275_s1 + $0x88] sm:$0xff]   ;;  %v2479_v11 = vld [vmem:[%s3275_s1 + $0x90] sm:$0xff]  }
   0x5   :  { %2308 = vmatpush3.bf16.msra.mxu1 %v2471_v3  ;;  %2287 = vmatprep.subr.bf16.mxu0 %v2472_v4  ;;  %v2480_v12 = vld [vmem:[%s3275_s1 + $0x58] sm:$0xff]   ;;  %v2484_v16 = vld [vmem:[%s3275_s1 + $0x60] sm:$0xff]   ;;  %v2488_v20 = vld [vmem:[%s3275_s1 + $0x68] sm:$0xff]  }
   0x6   :  { %2309 = vmatprep.subr.bf16.mxu1 %v2473_v5  ;;  %v2481_v13 = vld [vmem:[%s3275_s1 + $0xd8] sm:$0xff]   ;;  %v2485_v17 = vld [vmem:[%s3275_s1 + $0xe0] sm:$0xff]   ;;  %v2489_v21 = vld [vmem:[%s3275_s1 + $0xe8] sm:$0xff]  }
   0x7   :  { %v2482_v14 = vld [vmem:[%s3275_s1 + $0x18] sm:$0xff]   ;;  %v2486_v18 = vld [vmem:[%s3275_s1 + $0x20] sm:$0xff]   ;;  %v2490_v22 = vld [vmem:[%s3275_s1 + $0x28] sm:$0xff]  }
   0x8   :  { %2288 = vmatpush3.bf16.msra.mxu0 %v2474_v6  ;;  %v2483_v15 = vld [vmem:[%s3275_s1 + $0x98] sm:$0xff]   ;;  %v2487_v19 = vld [vmem:[%s3275_s1 + $0xa0] sm:$0xff]   ;;  %v2491_v23 = vld [vmem:[%s3275_s1 + $0xa8] sm:$0xff]  }
   0x9   :  { %2310 = vmatpush3.bf16.msra.mxu1 %v2475_v7  ;;  %2289 = vmatprep.subr.bf16.mxu0 %v2476_v8  ;;  %v2492_v24 = vld [vmem:[%s3275_s1 + $0x70] sm:$0xff]   ;;  %v2496_v28 = vld [vmem:[%s3275_s1 + $0x78] sm:$0xff]   ;;  %v2506_v36 = vld [vmem:[%s3275_s1 + $0x140] sm:$0xff]  }
   0xa   :  { %2311 = vmatprep.subr.bf16.mxu1 %v2477_v9  ;;  %v2493_v25 = vld [vmem:[%s3275_s1 + $0xf0] sm:$0xff]   ;;  %v2497_v29 = vld [vmem:[%s3275_s1 + $0xf8] sm:$0xff]   ;;  %v2507_v37 = vld [vmem:[%s3275_s1 + $0x1c0] sm:$0xff]  }
   0xb   :  { %v2494_v26 = vld [vmem:[%s3275_s1 + $0x30] sm:$0xff]   ;;  %v2498_v30 = vld [vmem:[%s3275_s1 + $0x38] sm:$0xff]   ;;  %v2508_v38 = vld [vmem:[%s3275_s1 + $0x100] sm:$0xff]  }
   0xc   :  { %2290 = vmatpush3.bf16.msra.mxu0 %v2478_v10  ;;  %v2495_v27 = vld [vmem:[%s3275_s1 + $0xb0] sm:$0xff]   ;;  %v2499_v31 = vld [vmem:[%s3275_s1 + $0xb8] sm:$0xff]   ;;  %v2509_v39 = vld [vmem:[%s3275_s1 + $0x180] sm:$0xff]  }
   0xd   :  { %2312 = vmatpush3.bf16.msra.mxu1 %v2479_v11  ;;  %2291 = vmatprep.subr.bf16.mxu0 %v2480_v12  ;;  %v2500_v32 = vld [vmem:[%s3274_s0] ss:$48 sps:$4 sm:$0xff]   ;;  %v2502_v33 = vld [vmem:[%s3274_s0 + $0x4] ss:$48 sps:$4 sm:$0xff]   ;;  %v2503_v34 = vld [vmem:[%s3274_s0 + $0x8] ss:$48 sps:$4 sm:$0xff]  }
   0xe   :  { %2313 = vmatprep.subr.bf16.mxu1 %v2481_v13  ;;  %v2505_v35 = vld [vmem:[%s3274_s0 + $0xc] ss:$48 sps:$4 sm:$0xff]   ;;  %903 = vmatprep.mubr.bf16.mxu0 %v2502_v33  ;;  %v2514_v44 = vld [vmem:[%s3275_s1 + $0x150] sm:$0xff]   ;;  %v2522_v52 = vld [vmem:[%s3275_s1 + $0x160] sm:$0xff]  }
   0xf   :  { %944 = vmatprep.mubr.bf16.mxu1 %v2505_v35  ;;  %v2510_v40 = vld [vmem:[%s3275_s1 + $0x148] sm:$0xff]   ;;  %v2515_v45 = vld [vmem:[%s3275_s1 + $0x1d0] sm:$0xff]   ;;  %v2518_v48 = vld [vmem:[%s3275_s1 + $0x158] sm:$0xff]  }
  0x10   :  { %2292 = vmatpush3.bf16.msra.mxu0 %v2482_v14  ;;  %v2511_v41 = vld [vmem:[%s3275_s1 + $0x1c8] sm:$0xff]   ;;  %v2516_v46 = vld [vmem:[%s3275_s1 + $0x110] sm:$0xff]   ;;  %v2519_v49 = vld [vmem:[%s3275_s1 + $0x1d8] sm:$0xff]  }
  0x11   :  { %2314 = vmatpush3.bf16.msra.mxu1 %v2483_v15  ;;  %2293 = vmatprep.subr.bf16.mxu0 %v2484_v16  ;;  %v2512_v42 = vld [vmem:[%s3275_s1 + $0x108] sm:$0xff]   ;;  %v2517_v47 = vld [vmem:[%s3275_s1 + $0x190] sm:$0xff]   ;;  %v2520_v50 = vld [vmem:[%s3275_s1 + $0x118] sm:$0xff]  }
  0x12   :  { %2315 = vmatprep.subr.bf16.mxu1 %v2485_v17  ;;  %v2513_v43 = vld [vmem:[%s3275_s1 + $0x188] sm:$0xff]   ;;  %v2521_v51 = vld [vmem:[%s3275_s1 + $0x198] sm:$0xff]   ;;  %v2523_v53 = vld [vmem:[%s3275_s1 + $0x1e0] sm:$0xff]  }
  0x13   :  { %v2524_v54 = vld [vmem:[%s3275_s1 + $0x120] sm:$0xff]   ;;  %v2526_v56 = vld [vmem:[%s3275_s1 + $0x168] sm:$0xff]   ;;  %v2530_v60 = vld [vmem:[%s3275_s1 + $0x170] sm:$0xff]  }
  0x14   :  { %2294 = vmatpush3.bf16.msra.mxu0 %v2486_v18  ;;  %v2525_v55 = vld [vmem:[%s3275_s1 + $0x1a0] sm:$0xff]   ;;  %v2527_v57 = vld [vmem:[%s3275_s1 + $0x1e8] sm:$0xff]   ;;  %v2531_v61 = vld [vmem:[%s3275_s1 + $0x1f0] sm:$0xff]  }
  0x15   :  { %2316 = vmatpush3.bf16.msra.mxu1 %v2487_v19  ;;  %2295 = vmatprep.subr.bf16.mxu0 %v2488_v20  ;;  %v2528_v58 = vld [vmem:[%s3275_s1 + $0x128] sm:$0xff]   ;;  %v2532_v62 = vld [vmem:[%s3275_s1 + $0x130] sm:$0xff]   ;;  %v2534_v0 = vld [vmem:[%s3275_s1 + $0x178] sm:$0xff]  }
  0x16   :  { %2317 = vmatprep.subr.bf16.mxu1 %v2489_v21  ;;  %v2529_v59 = vld [vmem:[%s3275_s1 + $0x1a8] sm:$0xff]   ;;  %v2533_v63 = vld [vmem:[%s3275_s1 + $0x1b0] sm:$0xff]   ;;  %v2535_v1 = vld [vmem:[%s3275_s1 + $0x1f8] sm:$0xff]  }
  0x17   :  { %v2536_v2 = vld [vmem:[%s3275_s1 + $0x138] sm:$0xff]   ;;  %v2538_v4 = vld [vmem:[%s3274_s0 + $0x10] ss:$48 sps:$4 sm:$0xff]   ;;  %v2540_v5 = vld [vmem:[%s3274_s0 + $0x14] ss:$48 sps:$4 sm:$0xff]  }
  0x18   :  { %2296 = vmatpush3.bf16.msra.mxu0 %v2490_v22  ;;  %v2537_v3 = vld [vmem:[%s3275_s1 + $0x1b8] sm:$0xff]   ;;  %v2544_v8 = vld [vmem:[%s3275_s1 + $0x240] sm:$0xff]   ;;  %v2548_v12 = vld [vmem:[%s3275_s1 + $0x248] sm:$0xff]  }
  0x19   :  { %2318 = vmatpush3.bf16.msra.mxu1 %v2491_v23  ;;  %2297 = vmatprep.subr.bf16.mxu0 %v2492_v24  ;;  %v2541_v6 = vld [vmem:[%s3274_s0 + $0x18] ss:$48 sps:$4 sm:$0xff]   ;;  %v2543_v7 = vld [vmem:[%s3274_s0 + $0x1c] ss:$48 sps:$4 sm:$0xff]   ;;  %v2545_v9 = vld [vmem:[%s3275_s1 + $0x2c0] sm:$0xff]  }
  0x1a   :  { %2319 = vmatprep.subr.bf16.mxu1 %v2493_v25  ;;  %v2546_v10 = vld [vmem:[%s3275_s1 + $0x200] sm:$0xff]   ;;  %v2549_v13 = vld [vmem:[%s3275_s1 + $0x2c8] sm:$0xff]   ;;  %v2552_v16 = vld [vmem:[%s3275_s1 + $0x250] sm:$0xff]  }
  0x1b   :  { %v2547_v11 = vld [vmem:[%s3275_s1 + $0x280] sm:$0xff]   ;;  %v2550_v14 = vld [vmem:[%s3275_s1 + $0x208] sm:$0xff]   ;;  %v2553_v17 = vld [vmem:[%s3275_s1 + $0x2d0] sm:$0xff]  }
  0x1c   :  { %2298 = vmatpush3.bf16.msra.mxu0 %v2494_v26  ;;  %v2551_v15 = vld [vmem:[%s3275_s1 + $0x288] sm:$0xff]   ;;  %v2554_v18 = vld [vmem:[%s3275_s1 + $0x210] sm:$0xff]   ;;  %v2556_v20 = vld [vmem:[%s3275_s1 + $0x258] sm:$0xff]  }
  0x1d   :  { %2320 = vmatpush3.bf16.msra.mxu1 %v2495_v27  ;;  %2299 = vmatprep.subr.bf16.mxu0 %v2496_v28  ;;  %v2555_v19 = vld [vmem:[%s3275_s1 + $0x290] sm:$0xff]   ;;  %v2557_v21 = vld [vmem:[%s3275_s1 + $0x2d8] sm:$0xff]   ;;  %v2560_v24 = vld [vmem:[%s3275_s1 + $0x260] sm:$0xff]  }
  0x1e   :  { %2321 = vmatprep.subr.bf16.mxu1 %v2497_v29  ;;  %v2558_v22 = vld [vmem:[%s3275_s1 + $0x218] sm:$0xff]   ;;  %v2561_v25 = vld [vmem:[%s3275_s1 + $0x2e0] sm:$0xff]   ;;  %v2564_v28 = vld [vmem:[%s3275_s1 + $0x268] sm:$0xff]  }
  0x1f   :  { %v2559_v23 = vld [vmem:[%s3275_s1 + $0x298] sm:$0xff]   ;;  %v2562_v26 = vld [vmem:[%s3275_s1 + $0x220] sm:$0xff]   ;;  %v2565_v29 = vld [vmem:[%s3275_s1 + $0x2e8] sm:$0xff]  }
  0x20   :  { %2300 = vmatpush3.bf16.msra.mxu0 %v2498_v30  ;;  %v2563_v27 = vld [vmem:[%s3275_s1 + $0x2a0] sm:$0xff]   ;;  %v2566_v30 = vld [vmem:[%s3275_s1 + $0x228] sm:$0xff]   ;;  %v2569_v33 = vld [vmem:[%s3275_s1 + $0x2f0] sm:$0xff]  }
  0x21   :  { %2322 = vmatpush3.bf16.msra.mxu1 %v2499_v31  ;;  %2329 = vmatprep.subr.bf16.mxu0 %v2506_v36  ;;  %v2567_v31 = vld [vmem:[%s3275_s1 + $0x2a8] sm:$0xff]   ;;  %v2571_v35 = vld [vmem:[%s3275_s1 + $0x2b0] sm:$0xff]   ;;  %v2572_v36 = vld [vmem:[%s3275_s1 + $0x278] sm:$0xff]  }
  0x22   :  { %2351 = vmatprep.subr.bf16.mxu1 %v2507_v37  ;;  %v2573_v37 = vld [vmem:[%s3275_s1 + $0x2f8] sm:$0xff]  }
  0x23   :  { %904 = vmatmul.mubr.bf16.vlgmr.msra.gmra.mrb[0].mxu0 %v2500_v32  ;;  %v2568_v32 = vld [vmem:[%s3275_s1 + $0x270] sm:$0xff]  }
  0x24   :  { %945 = vmatmul.mubr.bf16.vlgmr.msra.gmra.mrb[0].mxu1 %v2503_v34  ;;  %2330 = vmatpush3.bf16.msra.mxu0 %v2508_v38  ;;  %v2570_v34 = vld [vmem:[%s3275_s1 + $0x230] sm:$0xff]   ;;  %v2574_v38 = vld [vmem:[%s3275_s1 + $0x238] sm:$0xff]  }
  0x25   :  { %2352 = vmatpush3.bf16.msra.mxu1 %v2509_v39  ;;  %2331 = vmatprep.subr.bf16.mxu0 %v2510_v40  ;;  %v2575_v39 = vld [vmem:[%s3275_s1 + $0x2b8] sm:$0xff]   ;;  %v2576_v40 = vld [vmem:[%s3274_s0 + $0x20] ss:$48 sps:$4 sm:$0xff]  }
  0x26   :  { %2353 = vmatprep.subr.bf16.mxu1 %v2511_v41  ;;  %985 = vmatprep.mubr.bf16.mxu0 %v2540_v5  ;;  %v2578_v41 = vld [vmem:[%s3274_s0 + $0x24] ss:$48 sps:$4 sm:$0xff]  }
  0x27   :  { %1026 = vmatprep.mubr.bf16.mxu1 %v2543_v7 }
  0x28   :  { %2332 = vmatpush3.bf16.msra.mxu0 %v2512_v42  ;;  %v2579_v42 = vld [vmem:[%s3274_s0 + $0x28] ss:$48 sps:$4 sm:$0xff]  }
  0x29   :  { %2354 = vmatpush3.bf16.msra.mxu1 %v2513_v43  ;;  %2333 = vmatprep.subr.bf16.mxu0 %v2514_v44  ;;  %v2581_v43 = vld [vmem:[%s3274_s0 + $0x2c] ss:$48 sps:$4 sm:$0xff]  }
  0x2a   :  { %2355 = vmatprep.subr.bf16.mxu1 %v2515_v45 }
  0x2c   :  { %2334 = vmatpush3.bf16.msra.mxu0 %v2516_v46 }
  0x2d   :  { %2356 = vmatpush3.bf16.msra.mxu1 %v2517_v47  ;;  %2335 = vmatprep.subr.bf16.mxu0 %v2518_v48 }
  0x2e   :  { %2357 = vmatprep.subr.bf16.mxu1 %v2519_v49 }
  0x30   :  { %2336 = vmatpush3.bf16.msra.mxu0 %v2520_v50 }
  0x31   :  { %2358 = vmatpush3.bf16.msra.mxu1 %v2521_v51  ;;  %2337 = vmatprep.subr.bf16.mxu0 %v2522_v52 }
  0x32   :  { %2359 = vmatprep.subr.bf16.mxu1 %v2523_v53 }
  0x34   :  { %2338 = vmatpush3.bf16.msra.mxu0 %v2524_v54 }
  0x35   :  { %2360 = vmatpush3.bf16.msra.mxu1 %v2525_v55  ;;  %2339 = vmatprep.subr.bf16.mxu0 %v2526_v56 }
  0x36   :  { %2361 = vmatprep.subr.bf16.mxu1 %v2527_v57 }
  0x38   :  { %2340 = vmatpush3.bf16.msra.mxu0 %v2528_v58 }
  0x39   :  { %2362 = vmatpush3.bf16.msra.mxu1 %v2529_v59  ;;  %2341 = vmatprep.subr.bf16.mxu0 %v2530_v60 }
  0x3a   :  { %2363 = vmatprep.subr.bf16.mxu1 %v2531_v61 }
  0x3c   :  { %2342 = vmatpush3.bf16.msra.mxu0 %v2532_v62 }
  0x3d   :  { %2364 = vmatpush3.bf16.msra.mxu1 %v2533_v63  ;;  %2343 = vmatprep.subr.bf16.mxu0 %v2534_v0 }
  0x3e   :  { %2365 = vmatprep.subr.bf16.mxu1 %v2535_v1 }
  0x40   :  { %2344 = vmatpush3.bf16.msra.mxu0 %v2536_v2 }
  0x41   :  { %2366 = vmatpush3.bf16.msra.mxu1 %v2537_v3  ;;  %2373 = vmatprep.subr.bf16.mxu0 %v2544_v8 }
  0x42   :  { %2395 = vmatprep.subr.bf16.mxu1 %v2545_v9 }
  0x43   :  { %986 = vmatmul.mubr.bf16.vlgmr.msra.gmra.mrb[4].mxu0 %v2538_v4 }
  0x44   :  { %1027 = vmatmul.mubr.bf16.vlgmr.msra.gmra.mrb[4].mxu1 %v2541_v6  ;;  %2374 = vmatpush3.bf16.msra.mxu0 %v2546_v10 }
  0x45   :  { %2396 = vmatpush3.bf16.msra.mxu1 %v2547_v11  ;;  %2375 = vmatprep.subr.bf16.mxu0 %v2548_v12 }
  0x46   :  { %2397 = vmatprep.subr.bf16.mxu1 %v2549_v13  ;;  %1067 = vmatprep.mubr.bf16.mxu0 %v2578_v41 }
  0x47   :  { %1108 = vmatprep.mubr.bf16.mxu1 %v2581_v43 }
  0x48   :  { %2376 = vmatpush3.bf16.msra.mxu0 %v2550_v14 }
  0x49   :  { %2398 = vmatpush3.bf16.msra.mxu1 %v2551_v15  ;;  %2377 = vmatprep.subr.bf16.mxu0 %v2552_v16 }
  0x4a   :  { %2399 = vmatprep.subr.bf16.mxu1 %v2553_v17 }
  0x4c   :  { %2378 = vmatpush3.bf16.msra.mxu0 %v2554_v18 }
  0x4d   :  { %2400 = vmatpush3.bf16.msra.mxu1 %v2555_v19  ;;  %2379 = vmatprep.subr.bf16.mxu0 %v2556_v20 }
  0x4e   :  { %2401 = vmatprep.subr.bf16.mxu1 %v2557_v21 }
  0x50   :  { %2380 = vmatpush3.bf16.msra.mxu0 %v2558_v22 }
  0x51   :  { %2402 = vmatpush3.bf16.msra.mxu1 %v2559_v23  ;;  %2381 = vmatprep.subr.bf16.mxu0 %v2560_v24 }
  0x52   :  { %2403 = vmatprep.subr.bf16.mxu1 %v2561_v25 }
  0x54   :  { %2382 = vmatpush3.bf16.msra.mxu0 %v2562_v26 }
  0x55   :  { %2404 = vmatpush3.bf16.msra.mxu1 %v2563_v27  ;;  %2383 = vmatprep.subr.bf16.mxu0 %v2564_v28 }
  0x56   :  { %2405 = vmatprep.subr.bf16.mxu1 %v2565_v29 }
  0x58   :  { %2384 = vmatpush3.bf16.msra.mxu0 %v2566_v30 }
  0x59   :  { %2406 = vmatpush3.bf16.msra.mxu1 %v2567_v31  ;;  %2385 = vmatprep.subr.bf16.mxu0 %v2568_v32 }
  0x5a   :  { %2407 = vmatprep.subr.bf16.mxu1 %v2569_v33 }
  0x5c   :  { %2386 = vmatpush3.bf16.msra.mxu0 %v2570_v34 }
  0x5d   :  { %2408 = vmatpush3.bf16.msra.mxu1 %v2571_v35  ;;  %2387 = vmatprep.subr.bf16.mxu0 %v2572_v36 }
  0x5e   :  { %2409 = vmatprep.subr.bf16.mxu1 %v2573_v37 }
  0x60   :  { %2388 = vmatpush3.bf16.msra.mxu0 %v2574_v38 }
  0x61   :  { %2410 = vmatpush3.bf16.msra.mxu1 %v2575_v39 }
  0x63   :  { %1068 = vmatmul.mubr.bf16.vlgmr.msra.gmra.mrb[8].mxu0 %v2576_v40 }
  0x64   :  { %1109 = vmatmul.mubr.bf16.vlgmr.msra.gmra.mrb[8].mxu1 %v2579_v42 }
  0x65   :  { %8 = vsyncpa [#allocation3], 0  ;;  %v2582_v44 = vld [vmem:[%s3276_s2] ss:$8 sps:$4 sm:$0xff]   ;;  %v2669_v45 = vmov 0.0   ;;  %vm2670_vm0 = vmmov 0   ;;  %v16_v46 = vlaneseq }
  0x66   :  { %2446 = vmatprep.subr.bf16.mxu0 %v2669_v45  ;;  %2448 = vmatprep.mubr.msk.bf16.mxu0 %vm2670_vm0, %v2669_v45  ;;  %v3029_v48 = vld [vmem:[%s3276_s2 + $0x230] sm:$0x1]  ;;  %vm1136_vm3 = vcmask 130048   ;;  %v2585_v41 = vld [vmem:[%s3276_s2 + $0x14] ss:$8 sps:$4 sm:$0xff]   ;;  %vm1193_vm6 = vcmask 1041408  }
  0x67   :  { %2447 = vmatpush3.bf16.msra.mxu0 %v2582_v44  ;;  %v3024_v47 = vshrl.u32 %v16_v46, 7  ;;  %v230_v49 = vunpack.c.l.bf16 %v3029_v48  ;;  %v2583_v42 = vld [vmem:[%s3276_s2 + $0x10] ss:$8 sps:$4 sm:$0xff]   ;;  %1307 = vmatprep.subr.bf16.mxu1 %v2585_v41  ;;  %v2589_v44 = vld [vmem:[%s3276_s2 + $0x24] ss:$8 sps:$4 sm:$0xff]   ;;  %vm1200_vm8 = vcmask 1045504  }
  0x68   :  { %2452 = vmatprep.subr.bf16.mxu0 %v2669_v45  ;;  %v2586_v43 = vld [vmem:[%s3276_s2 + $0x50] ss:$8 sps:$4 sm:$0xff]   ;;  %1308 = vmatpush1.bf16.msra.mxu1 %v2583_v42  ;;  %v2587_v46 = vld [vmem:[%s3276_s2 + $0x20] ss:$8 sps:$4 sm:$0xff]   ;;  %vm1303_vm11 = vcmask 523264   ;;  %s2672_s1 = smov [#allocation2]  }
  0x69   :  { %v233_v50 = vsub.s32 0, %v3024_v47  ;;  %1309 = vmatprep.subr.bf16.mxu1 %v2589_v44  ;;  %v2601_v42 = vld [vmem:[%s3276_s2 + $0x120] ss:$8 sps:$4 sm:$0xff]   ;;  %v2603_v44 = vld [vmem:[%s3276_s2 + $0x130] ss:$8 sps:$4 sm:$0xff]   ;;  %s2110_s12 = sshll.u32 %s2672_s1, 4  ;;  %s2111_s12 = int_to_ptr.vmem [resolvable:$true] %s2110_s12 }
  0x6a   :  { %p2650_p1 = scmp.lt.s32.totalorder %s2111_s12, %s2111_s12 }
  0x6b   :  { %v234_v52 = vrot.slane %v230_v49, %v233_v50 }
  0x6c   :  { %1310 = vmatpush1.bf16.msra.mxu1 %v2587_v46  ;;  %v2604_v46 = vld [vmem:[%s3276_s2 + $0xb0] ss:$8 sps:$4 sm:$0xff]  }
  0xf6   :  { %v2301_v51 = vpop.f32.mrb[0].mxu0 }
  0xf7   :  { %v2323_v53 = vpop.f32.mrb[0].mxu1  ;;  %v2302_v54 = vpop.f32.mrb[1].mxu0 }
  0xf8   :  { %v2303_v55 = vadd.f32 %v2302_v54, %v2301_v51  ;;  %v2324_v56 = vpop.f32.mrb[1].mxu1  ;;  %v2304_v57 = vpop.f32.mrb[2].mxu0  ;;  %v2590_v51 = vld [vmem:[%s3276_s2 + $0x60] ss:$8 sps:$4 sm:$0xff]   ;;  %v2594_v54 = vld [vmem:[%s3276_s2 + $0x70] ss:$8 sps:$4 sm:$0xff]  }
  0xf9   :  { %v2325_v58 = vadd.f32 %v2324_v56, %v2323_v53  ;;  %v2326_v59 = vpop.f32.mrb[2].mxu1  ;;  %v2305_v60 = vpop.f32.mrb[3].mxu0  ;;  %v2591_v53 = vld [vmem:[%s3276_s2 + $0x30] ss:$8 sps:$4 sm:$0xff]   ;;  %v2595_v56 = vld [vmem:[%s3276_s2 + $0x40] ss:$8 sps:$4 sm:$0xff]  }
  0xfa   :  { %v906_v61 = vadd.f32 %v2303_v55, %v234_v52  ;;  %v2306_v62 = vadd.f32 %v2305_v60, %v2304_v57  ;;  %v2327_v63 = vpop.f32.mrb[3].mxu1  ;;  %v2597_v55 = vld [vmem:[%s3276_s2 + $0x44] ss:$8 sps:$4 sm:$0xff]   ;;  %v2598_v57 = vld [vmem:[%s3276_s2 + $0x80] ss:$8 sps:$4 sm:$0xff]   ;;  %v1128_v60 = vsub.s32 1, %v3024_v47 }
  0xfb   :  { %v2328_v0 = vadd.f32 %v2327_v63, %v2326_v59  ;;  %v2599_v59 = vld [vmem:[%s3276_s2 + $0x110] ss:$8 sps:$4 sm:$0xff]   ;;  %v18_v63 = vadd.s32 8, %v3024_v47 }
  0xfc   :  { %v947_v1 = vadd.f32 %v2325_v58, %v906_v61  ;;  %v909_v2 = vadd.f32 %v2306_v62, %v234_v52  ;;  %v2593_v52 = vld [vmem:[%s3276_s2 + $0x34] ss:$8 sps:$4 sm:$0xff]   ;;  %v2671_v58 = vmov 0   ;;  %v1187_v61 = vld [vmem:[%s3276_s2 + $0x238] sm:$0x3]  ;;  %v1129_v62 = vrot.slane %v230_v49, %v1128_v60 }
  0xfd   :  { %1311 = vmatprep.subr.bf16.mxu1 %v2593_v52  ;;  %1339 = vmatprep.mubr.bf16.mxu1 %v2671_v58  ;;  %vm20_vm4 = vcmp.lt.s32.totalorder %v18_v63, 10  ;;  %v2606_v52 = vld [vmem:[%s3276_s2 + $0xc0] ss:$8 sps:$4 sm:$0xff]  }
  0xfe   :  { %v950_v3 = vadd.f32 %v2328_v0, %v909_v2  ;;  %1312 = vmatpush1.bf16.msra.mxu1 %v2591_v53  ;;  %v1207_v0 = vunpack.c.l.bf16 %v1187_v61  ;;  %v3092_v48 = vsel %vm20_vm4, 1.0, %v2669_v45  ;;  %v2607_v53 = vld [vmem:[%s3276_s2 + $0x150] ss:$8 sps:$4 sm:$0xff]   ;;  %v2614_v61 = vld [vmem:[%s3276_s2 + $0x100] ss:$8 sps:$4 sm:$0xff]   ;;  %vm1757_vm4 = vcmask 261120  }
  0xff   :  { %1313 = vmatprep.subr.bf16.mxu1 %v2597_v55  ;;  %v2609_v55 = vld [vmem:[%s3276_s2 + $0x160] ss:$8 sps:$4 sm:$0xff]  }
 0x102   :  { %1314 = vmatpush1.bf16.msra.mxu1 %v2595_v56  ;;  %v2610_v56 = vld [vmem:[%s3276_s2 + $0xe0] ss:$8 sps:$4 sm:$0xff]  }
 0x103   :  { %2424 = vmatprep.subr.bf16.mxu1 %v2599_v59  ;;  %v2612_v59 = vld [vmem:[%s3276_s2 + $0xf0] ss:$8 sps:$4 sm:$0xff]  }
 0x116   :  { %v2345_v4 = vpop.f32.mrb[4].mxu0 }
 0x117   :  { %v2346_v5 = vpop.f32.mrb[5].mxu0  ;;  %v2367_v6 = vpop.f32.mrb[4].mxu1 }
 0x118   :  { %v2347_v7 = vadd.f32 %v2346_v5, %v2345_v4  ;;  %v2348_v8 = vpop.f32.mrb[6].mxu0  ;;  %v2368_v9 = vpop.f32.mrb[5].mxu1 }
 0x119   :  { %v2349_v10 = vpop.f32.mrb[7].mxu0  ;;  %v2369_v12 = vadd.f32 %v2368_v9, %v2367_v6  ;;  %v2370_v13 = vpop.f32.mrb[6].mxu1  ;;  %v1217_v9 = vrot.slane %v1207_v0, %v1128_v60  ;;  %v2613_v60 = vld [vmem:[%s3276_s2 + $0x180] ss:$8 sps:$4 sm:$0xff]  }
 0x11a   :  { %v988_v11 = vadd.f32 %v2347_v7, %v947_v1  ;;  %v2350_v14 = vadd.f32 %v2349_v10, %v2348_v8  ;;  %v2371_v15 = vpop.f32.mrb[7].mxu1  ;;  %v1211_v8 = vrot.slane %v1207_v0, %v233_v50 }
 0x11b   :  { %v2372_v18 = vadd.f32 %v2371_v15, %v2370_v13  ;;  %v1188_v13 = vld [vmem:[%s3276_s2 + $0x230] sm:$0x2] }
 0x11c   :  { %v1029_v16 = vadd.f32 %v2369_v12, %v988_v11  ;;  %v991_v17 = vadd.f32 %v2350_v14, %v950_v3  ;;  %v1224_v11 = vsub.s32 2, %v3024_v47 }
 0x11e   :  { %v1032_v19 = vadd.f32 %v2372_v18, %v991_v17  ;;  %v1230_v18 = vunpack.c.l.bf16 %v1188_v13 }
 0x136   :  { %v2389_v20 = vpop.f32.mrb[8].mxu0 }
 0x137   :  { %v2411_v21 = vpop.f32.mrb[8].mxu1  ;;  %v2390_v22 = vpop.f32.mrb[9].mxu0 }
 0x138   :  { %v2391_v23 = vadd.f32 %v2390_v22, %v2389_v20  ;;  %v2412_v24 = vpop.f32.mrb[9].mxu1  ;;  %v2392_v25 = vpop.f32.mrb[10].mxu0 }
 0x139   :  { %v2413_v26 = vadd.f32 %v2412_v24, %v2411_v21  ;;  %v2414_v27 = vpop.f32.mrb[10].mxu1  ;;  %v2393_v28 = vpop.f32.mrb[11].mxu0 }
 0x13a   :  { %v1070_v29 = vadd.f32 %v2391_v23, %v1029_v16  ;;  %v2394_v30 = vadd.f32 %v2393_v28, %v2392_v25  ;;  %v2415_v31 = vpop.f32.mrb[11].mxu1 }
 0x13b   :  { %v2416_v32 = vadd.f32 %v2415_v31, %v2414_v27 }
 0x13c   :  { %v1111_v33 = vadd.f32 %v2413_v26, %v1070_v29  ;;  %v1073_v34 = vadd.f32 %v2394_v30, %v1032_v19  ;;  %v1234_v29 = vrot.slane %v1230_v18, %v1224_v11 }
 0x13e   :  { %v1119_v35 = vmul.f32 0.2, %v1111_v33  ;;  %v1114_v36 = vadd.f32 %v2416_v32, %v1073_v34  ;;  %vm1117_vm1 = vcmp.ge.f32.partialorder %v1111_v33, 0.0 }
 0x140   :  { %vm1118_vm2 = vcmp.ge.f32.partialorder %v1114_v36, 0.0  ;;  %v1120_v37 = vmul.f32 0.2, %v1114_v36  ;;  %v1121_v38 = vsel %vm1117_vm1, %v1111_v33, %v1119_v35 }
 0x142   :  { %v1122_v39 = vsel %vm1118_vm2, %v1114_v36, %v1120_v37 }
 0x143   :  { %v1123_v40 = vpack.c.bf16 %v1122_v39, %v1121_v38 }
 0x145   :  { %2449 = vmatmul.mubr.msk.bf16.vlgmr.msra.gmra.mrb[12].mxu0 %vm1136_vm3, %v1123_v40  ;;  %v2600_v40 = vld [vmem:[%s3276_s2 + $0x90] ss:$8 sps:$4 sm:$0xff]  }
 0x146   :  { %2460 = vmatprep.mubr.msk.bf16.mxu0 %vm2670_vm0, %v2669_v45  ;;  %2453 = vmatpush3.bf16.msra.mxu0 %v2586_v43  ;;  %v2602_v43 = vld [vmem:[%s3276_s2 + $0xa0] ss:$8 sps:$4 sm:$0xff]  }
 0x147   :  { %2454 = vmatprep.subr.bf16.mxu0 %v2669_v45 }
 0x14a   :  { %2455 = vmatpush3.bf16.msra.mxu0 %v2590_v51  ;;  %v2605_v51 = vld [vmem:[%s3276_s2 + $0x140] ss:$8 sps:$4 sm:$0xff]  }
 0x14b   :  { %2456 = vmatprep.subr.bf16.mxu0 %v2669_v45 }
 0x14e   :  { %2457 = vmatpush3.bf16.msra.mxu0 %v2594_v54  ;;  %v2608_v54 = vld [vmem:[%s3276_s2 + $0xd0] ss:$8 sps:$4 sm:$0xff]  }
 0x14f   :  { %2458 = vmatprep.subr.bf16.mxu0 %v2669_v45  ;;  %v1225_v45 = vrot.slane %v1207_v0, %v1224_v11  ;;  %v1257_v0 = vsub.s32 3, %v3024_v47 }
 0x152   :  { %2459 = vmatpush3.bf16.msra.mxu0 %v2598_v57  ;;  %v2611_v57 = vld [vmem:[%s3276_s2 + $0x170] ss:$8 sps:$4 sm:$0xff]  }
 0x218   :  { %v1174_v1 = vpop.f32.mrb[12].mxu0 }
 0x219   :  { %v1175_v2 = vadd.f32 %v1174_v1, %v1129_v62  ;;  %v2450_v3 = vpop.f32.mrb[13].mxu0 }
 0x21a   :  { %v1177_v4 = vpop.f32.mrb[14].mxu0 }
 0x21b   :  { %vm1181_vm5 = vcmp.ge.f32.partialorder %v1175_v2, 0.0  ;;  %v1183_v5 = vmul.f32 0.2, %v1175_v2  ;;  %v1178_v6 = vadd.f32 %v1177_v4, %v1129_v62  ;;  %v2451_v7 = vpop.f32.mrb[15].mxu0  ;;  %v1252_v62 = vld [vmem:[%s3276_s2 + $0x230] sm:$0x22] }
 0x21c   :  { %v1253_v63 = vunpack.c.l.bf16 %v1252_v62  ;;  %v1254_v1 = vunpack.c.h.bf16 %v1252_v62  ;;  %v1441_v4 = vld [vmem:[%s3276_s2 + $0x238] sm:$0x66] }
 0x21d   :  { %v1185_v49 = vsel %vm1181_vm5, %v1175_v2, %v1183_v5  ;;  %vm1182_vm7 = vcmp.ge.f32.partialorder %v1178_v6, 0.0  ;;  %v1184_v10 = vmul.f32 0.2, %v1178_v6 }
 0x21e   :  { %v1194_v12 = vrot.slane %v1185_v49, 6  ;;  %v1218_v17 = vmul.f32 %v1217_v9, %v1185_v49  ;;  %v1201_v19 = vrot.slane %v1185_v49, 2  ;;  %v1258_v2 = vrot.slane %v1253_v63, %v1257_v0 }
 0x21f   :  { %v1186_v14 = vsel %vm1182_vm7, %v1178_v6, %v1184_v10  ;;  %v1262_v3 = vrot.slane %v1254_v1, %v1257_v0  ;;  %v1475_v49 = vunpack.c.l.bf16 %v1441_v4 }
 0x220   :  { %v1199_v15 = vsel %vm1193_vm6, 0.0, %v1194_v12  ;;  %v1190_v50 = vmul.f32 %v3092_v48, %v1186_v14  ;;  %v1491_v14 = vsub.s32 4, %v3024_v47 }
 0x221   :  { %v1212_v16 = vmul.f32 %v1211_v8, %v1199_v15 }
 0x222   :  { %v1195_v20 = vrot.slane %v1190_v50, 6  ;;  %v1202_v21 = vrot.slane %v1190_v50, 2  ;;  %v1219_v27 = vmul.f32 %v1217_v9, %v1190_v50 }
 0x223   :  { %v1220_v22 = vadd.f32 %v1218_v17, %v1212_v16 }
 0x224   :  { %v1196_v23 = vsel %vm1193_vm6, %v1194_v12, %v1195_v20  ;;  %v1203_v24 = vsel %vm1200_vm8, %v1201_v19, %v1202_v21  ;;  %v1206_v25 = vsel %vm1200_vm8, %v1202_v21, 0.0  ;;  %v3162_v21 = vsub.s32 5, %v3024_v47 }
 0x225   :  { %v1213_v26 = vmul.f32 %v1211_v8, %v1196_v23  ;;  %v1226_v28 = vmul.f32 %v1225_v45, %v1203_v24  ;;  %v1227_v31 = vmul.f32 %v1225_v45, %v1206_v25  ;;  %v1476_v45 = vunpack.c.h.bf16 %v1441_v4  ;;  %v1442_v25 = vld [vmem:[%s3276_s2 + $0x230] sm:$0x44] }
 0x226   :  { %v1480_v23 = vrot.slane %v1475_v49, %v1257_v0 }
 0x227   :  { %v1221_v30 = vadd.f32 %v1219_v27, %v1213_v26  ;;  %v1228_v32 = vadd.f32 %v1226_v28, %v1220_v22  ;;  %v1492_v26 = vrot.slane %v1475_v49, %v1491_v14  ;;  %v1484_v28 = vrot.slane %v1476_v45, %v1257_v0 }
 0x229   :  { %v1229_v33 = vadd.f32 %v1227_v31, %v1221_v30  ;;  %v1235_v34 = vadd.f32 %v1234_v29, %v1228_v32 }
 0x22b   :  { %v1236_v35 = vadd.f32 %v1234_v29, %v1229_v33  ;;  %v1239_v36 = vmul.f32 0.2, %v1235_v34  ;;  %vm1237_vm9 = vcmp.ge.f32.partialorder %v1235_v34, 0.0 }
 0x22d   :  { %vm1238_vm10 = vcmp.ge.f32.partialorder %v1236_v35, 0.0  ;;  %v1240_v37 = vmul.f32 0.2, %v1236_v35  ;;  %v1241_v38 = vsel %vm1237_vm9, %v1235_v34, %v1239_v36  ;;  %v1496_v34 = vrot.slane %v1476_v45, %v1491_v14 }
 0x22e   :  { %v1521_v36 = vunpack.c.l.bf16 %v1442_v25 }
 0x22f   :  { %v1242_v39 = vsel %vm1238_vm10, %v1236_v35, %v1240_v37  ;;  %v1508_v35 = vrot.slane %v1475_v49, %v3162_v21 }
 0x230   :  { %v1243_v41 = vpack.c.bf16 %v1242_v39, %v1241_v38  ;;  %v1526_v62 = vrot.slane %v1521_v36, %v1491_v14  ;;  %v2621_v36 = vld [vmem:[%s3276_s2 + $0x1c0] ss:$8 sps:$4 sm:$0xff]  }
 0x232   :  { %2237 = vmatmul.mubr.msk.bf16.vlgmr.msra.gmra.mrb[12].mxu1 %vm1303_vm11, %v1243_v41  ;;  %2461 = vmatmul.mubr.msk.bf16.vlgmr.msra.gmra.mrb[16].mxu0 %vm1303_vm11, %v1243_v41 }
 0x233   :  { %2425 = vmatpush3.bf16.msra.mxu1 %v2600_v40  ;;  %1793 = vmatprep.mubr.bf16.mxu0 %v2671_v58 }
 0x234   :  { %2426 = vmatprep.subr.bf16.mxu1 %v2601_v42 }
 0x237   :  { %2427 = vmatpush3.bf16.msra.mxu1 %v2602_v43  ;;  %v1512_v43 = vrot.slane %v1476_v45, %v3162_v21 }
 0x238   :  { %2428 = vmatprep.subr.bf16.mxu1 %v2603_v44  ;;  %v1522_v44 = vunpack.c.h.bf16 %v1442_v25 }
 0x23a   :  { %v1530_v4 = vrot.slane %v1522_v44, %v1491_v14 }
 0x23b   :  { %2429 = vmatpush3.bf16.msra.mxu1 %v2604_v46 }
 0x23c   :  { %2430 = vmatprep.subr.bf16.mxu1 %v2605_v51 }
 0x23f   :  { %2431 = vmatpush3.bf16.msra.mxu1 %v2606_v52 }
 0x240   :  { %2432 = vmatprep.subr.bf16.mxu1 %v2607_v53 }
 0x243   :  { %2433 = vmatpush3.bf16.msra.mxu1 %v2608_v54 }
 0x244   :  { %2434 = vmatprep.subr.bf16.mxu1 %v2609_v55 }
 0x247   :  { %2435 = vmatpush3.bf16.msra.mxu1 %v2610_v56 }
 0x248   :  { %2436 = vmatprep.subr.bf16.mxu1 %v2611_v57 }
 0x24b   :  { %2437 = vmatpush3.bf16.msra.mxu1 %v2612_v59 }
 0x24c   :  { %2438 = vmatprep.subr.bf16.mxu1 %v2613_v60 }
 0x24f   :  { %2439 = vmatpush3.bf16.msra.mxu1 %v2614_v61 }
 0x305   :  { %v1341_v5 = vpop.f32.mrb[12].mxu1  ;;  %v3156_v6 = vpop.f32.mrb[16].mxu0 }
 0x306   :  { %v1342_v7 = vadd.f32 %v1341_v5, %v1258_v2  ;;  %v1343_v8 = vpop.f32.mrb[13].mxu1  ;;  %v2462_v9 = vpop.f32.mrb[17].mxu0 }
 0x307   :  { %v1344_v10 = vadd.f32 %v1343_v8, %v1262_v3  ;;  %v1345_v11 = vpop.f32.mrb[14].mxu1  ;;  %v3158_v12 = vpop.f32.mrb[18].mxu0 }
 0x308   :  { %vm1350_vm12 = vcmp.ge.f32.partialorder %v1342_v7, 0.0  ;;  %v1354_v13 = vmul.f32 0.2, %v1342_v7  ;;  %v1346_v15 = vadd.f32 %v1345_v11, %v1258_v2  ;;  %v1347_v50 = vpop.f32.mrb[15].mxu1  ;;  %v2463_v16 = vpop.f32.mrb[19].mxu0 }
 0x309   :  { %vm1351_vm13 = vcmp.ge.f32.partialorder %v1344_v10, 0.0  ;;  %v1355_v17 = vmul.f32 0.2, %v1344_v10  ;;  %v1348_v18 = vadd.f32 %v1347_v50, %v1262_v3 }
 0x30a   :  { %v1358_v19 = vsel %vm1350_vm12, %v1342_v7, %v1354_v13  ;;  %vm1352_vm14 = vcmp.ge.f32.partialorder %v1346_v15, 0.0  ;;  %v1356_v20 = vmul.f32 0.2, %v1346_v15 }
 0x30b   :  { %v1451_v22 = vrot.slane %v1358_v19, 6  ;;  %v1359_v24 = vsel %vm1351_vm13, %v1344_v10, %v1355_v17  ;;  %vm1353_vm15 = vcmp.ge.f32.partialorder %v1348_v18, 0.0  ;;  %v1357_v32 = vmul.f32 0.2, %v1348_v18 }
 0x30c   :  { %v1452_v27 = vrot.slane %v1359_v24, 6  ;;  %v1360_v29 = vsel %vm1352_vm14, %v1346_v15, %v1356_v20  ;;  %v1463_v37 = vrot.slane %v1358_v19, 2  ;;  %v1497_v41 = vmul.f32 %v1492_v26, %v1358_v19 }
 0x30d   :  { %v1461_v30 = vsel %vm1193_vm6, 0.0, %v1451_v22  ;;  %v1445_v31 = vmul.f32 %v3092_v48, %v1360_v29  ;;  %v1361_v42 = vsel %vm1353_vm15, %v1348_v18, %v1357_v32  ;;  %v1466_v60 = vrot.slane %v1359_v24, 2  ;;  %v2615_v32 = vld [vmem:[%s3276_s2 + $0x1b0] ss:$8 sps:$4 sm:$0xff]  }
 0x30e   :  { %v1462_v33 = vsel %vm1193_vm6, 0.0, %v1452_v27  ;;  %v1485_v38 = vmul.f32 %v1480_v23, %v1461_v30  ;;  %v1446_v57 = vmul.f32 %v3092_v48, %v1361_v42  ;;  %v1498_v61 = vmul.f32 %v1496_v34, %v1359_v24  ;;  %v2617_v30 = vld [vmem:[%s3276_s2 + $0x1b4] ss:$8 sps:$4 sm:$0xff]  }
 0x30f   :  { %v1453_v39 = vrot.slane %v1445_v31, 6  ;;  %v1464_v40 = vrot.slane %v1445_v31, 2  ;;  %v1486_v46 = vmul.f32 %v1484_v28, %v1462_v33  ;;  %v1499_v55 = vmul.f32 %v1492_v26, %v1445_v31  ;;  %v2620_v31 = vld [vmem:[%s3276_s2 + $0x214] ss:$8 sps:$4 sm:$0xff]   ;;  %v2618_v33 = vld [vmem:[%s3276_s2 + $0x210] ss:$8 sps:$4 sm:$0xff]   ;;  %1761 = vmatprep.subr.bf16.mxu0 %v2617_v30 }
 0x310   :  { %v1501_v59 = vadd.f32 %v1497_v41, %v1485_v38  ;;  %v1455_v1 = vrot.slane %v1446_v57, 6  ;;  %v1467_v2 = vrot.slane %v1446_v57, 2  ;;  %v1500_v48 = vmul.f32 %v1496_v34, %v1446_v57  ;;  %2036 = vmatprep.subr.bf16.mxu1 %v2620_v31  ;;  %1762 = vmatpush1.bf16.msra.mxu0 %v2615_v32  ;;  %v2623_v34 = vld [vmem:[%s3276_s2 + $0x1c4] ss:$8 sps:$4 sm:$0xff]   ;;  %v2629_v38 = vld [vmem:[%s3276_s2 + $0x194] ss:$8 sps:$4 sm:$0xff]  }
 0x311   :  { %v1454_v51 = vsel %vm1193_vm6, %v1451_v22, %v1453_v39  ;;  %v1465_v52 = vsel %vm1200_vm8, %v1463_v37, %v1464_v40  ;;  %v1473_v53 = vsel %vm1200_vm8, %v1464_v40, 0.0  ;;  %v1502_v3 = vadd.f32 %v1498_v61, %v1486_v46  ;;  %v2624_v37 = vld [vmem:[%s3276_s2 + $0x220] ss:$8 sps:$4 sm:$0xff]   ;;  %1763 = vmatprep.subr.bf16.mxu0 %v2623_v34  ;;  %v1370_v39 = vld [vmem:[%s3276_s2 + $0x230] sm:$0x8] }
 0x312   :  { %v1487_v54 = vmul.f32 %v1480_v23, %v1454_v51  ;;  %v1513_v56 = vmul.f32 %v1508_v35, %v1465_v52  ;;  %v1515_v0 = vmul.f32 %v1508_v35, %v1473_v53  ;;  %v1456_v8 = vsel %vm1193_vm6, %v1452_v27, %v1455_v1  ;;  %v2626_v35 = vld [vmem:[%s3276_s2 + $0x224] ss:$8 sps:$4 sm:$0xff]   ;;  %v1581_v40 = vld [vmem:[%s3276_s2 + $0x230] sm:$0x4]  ;;  %v2079_v30 = vld [vmem:[%s3276_s2 + $0x230] sm:$0x88] }
 0x313   :  { %v1474_v9 = vsel %vm1200_vm8, %v1467_v2, 0.0  ;;  %v1468_v49 = vsel %vm1200_vm8, %v1466_v60, %v1467_v2  ;;  %v1488_v10 = vmul.f32 %v1484_v28, %v1456_v8  ;;  %v1371_v41 = vunpack.c.l.bf16 %v1370_v39  ;;  %v2627_v1 = vld [vmem:[%s3276_s2 + $0x190] ss:$8 sps:$4 sm:$0xff]   ;;  %v2641_v8 = vld [vmem:[%s3276_s2 + $0x1f4] ss:$8 sps:$4 sm:$0xff]  }
 0x314   :  { %v1503_v63 = vadd.f32 %v1499_v55, %v1487_v54  ;;  %v1517_v5 = vadd.f32 %v1513_v56, %v1501_v59  ;;  %v1514_v11 = vmul.f32 %v1512_v43, %v1468_v49  ;;  %v1516_v15 = vmul.f32 %v1512_v43, %v1474_v9  ;;  %1764 = vmatpush1.bf16.msra.mxu0 %v2621_v36  ;;  %v2639_v9 = vld [vmem:[%s3276_s2 + $0x1f0] ss:$8 sps:$4 sm:$0xff]  }
 0x315   :  { %v1504_v16 = vadd.f32 %v1500_v48, %v1488_v10  ;;  %1825 = vmatprep.subr.bf16.mxu0 %v2629_v38  ;;  %v1374_v42 = vsub.s32 6, %v3024_v47  ;;  %v1582_v43 = vunpack.c.l.bf16 %v1581_v40  ;;  %v2644_v10 = vld [vmem:[%s3276_s2 + $0x204] ss:$8 sps:$4 sm:$0xff]   ;;  %v2642_v48 = vld [vmem:[%s3276_s2 + $0x200] ss:$8 sps:$4 sm:$0xff]   ;;  %v2080_v32 = vunpack.c.l.bf16 %v2079_v30 }
 0x316   :  { %v1519_v7 = vadd.f32 %v1515_v0, %v1503_v63  ;;  %v1531_v13 = vadd.f32 %v1526_v62, %v1517_v5  ;;  %v1518_v17 = vadd.f32 %v1514_v11, %v1502_v3  ;;  %v2632_v3 = vld [vmem:[%s3276_s2 + $0x1a4] ss:$8 sps:$4 sm:$0xff]   ;;  %v2081_v34 = vunpack.c.h.bf16 %v2079_v30 }
 0x317   :  { %v1520_v18 = vadd.f32 %v1516_v15, %v1504_v16  ;;  %v1375_v44 = vrot.slane %v1371_v41, %v1374_v42  ;;  %v1586_v51 = vrot.slane %v1582_v43, %v3162_v21  ;;  %v2638_v5 = vld [vmem:[%s3276_s2 + $0x1e4] ss:$8 sps:$4 sm:$0xff]  }
 0x318   :  { %v1533_v50 = vadd.f32 %v1526_v62, %v1519_v7  ;;  %vm1535_vm0 = vcmp.ge.f32.partialorder %v1531_v13, 0.0  ;;  %v1539_v45 = vmul.f32 0.2, %v1531_v13  ;;  %v1532_v19 = vadd.f32 %v1530_v4, %v1518_v17  ;;  %v2636_v7 = vld [vmem:[%s3276_s2 + $0x1e0] ss:$8 sps:$4 sm:$0xff]  }
 0x319   :  { %v1534_v23 = vadd.f32 %v1530_v4, %v1520_v18  ;;  %v1435_v56 = vadd.f32 %v3156_v6, %v1375_v44  ;;  %v1438_v60 = vadd.f32 %v3158_v12, %v1375_v44  ;;  %v2630_v6 = vld [vmem:[%s3276_s2 + $0x1a0] ss:$8 sps:$4 sm:$0xff]   ;;  %v2635_v12 = vld [vmem:[%s3276_s2 + $0x1d4] ss:$8 sps:$4 sm:$0xff]   ;;  %v2633_v4 = vld [vmem:[%s3276_s2 + $0x1d0] ss:$8 sps:$4 sm:$0xff]  }
 0x31a   :  { %vm1537_vm1 = vcmp.ge.f32.partialorder %v1533_v50, 0.0  ;;  %v1541_v14 = vmul.f32 0.2, %v1533_v50  ;;  %v1543_v20 = vsel %vm1535_vm0, %v1531_v13, %v1539_v45  ;;  %v1540_v24 = vmul.f32 0.2, %v1532_v19  ;;  %s2645_s2 = scalar_lea.vmem %s2111_s12, 64 }
 0x31b   :  { %vm1536_vm2 = vcmp.ge.f32.partialorder %v1532_v19, 0.0  ;;  %vm1538_vm3 = vcmp.ge.f32.partialorder %v1534_v23, 0.0  ;;  %v1542_v26 = vmul.f32 0.2, %v1534_v23  ;;  %p2646_p0 = scmp.ne.s32.totalorder %s2111_s12, %s2645_s2  ;;  %p2651_p2 = scmp.lt.s32.totalorder %s2645_s2, %s2645_s2 }
 0x31c   :  { %v1545_v22 = vsel %vm1537_vm1, %v1533_v50, %v1541_v14  ;;  %v1544_v27 = vsel %vm1536_vm2, %v1532_v19, %v1540_v24 }
 0x31d   :  { %v1547_v25 = vpack.c.bf16 %v1545_v22, %v1543_v20  ;;  %v1546_v28 = vsel %vm1538_vm3, %v1534_v23, %v1542_v26  ;;  %p2652_p3 = por %p2651_p2, %p2650_p1 }
 0x31e   :  { %v1548_v29 = vpack.c.bf16 %v1546_v28, %v1544_v27 }
 0x31f   :  { %p2653_p4 = pnand %p2652_p3, %p2646_p0 }
 0x320   :  { %1715 = vmatprep.mubr.bf16.mxu1 %v1548_v29 }
 0x321   :  { %1716 = vmatmul.mubr.bf16.vlgmr.msra.gmra.mrb[16].mxu1 %v1547_v25 }
 0x322   :  { %2068 = vmatprep.mubr.bf16.mxu1 %v2671_v58  ;;  %2037 = vmatpush1.bf16.msra.mxu1 %v2618_v33  ;;  %v2084_v33 = vsub.s32 7, %v3024_v47 }
 0x323   :  { %2038 = vmatprep.subr.bf16.mxu1 %v2626_v35 }
 0x324   :  { %v2085_v38 = vrot.slane %v2080_v32, %v2084_v33  ;;  %v2089_v41 = vrot.slane %v2081_v34, %v2084_v33 }
 0x326   :  { %2039 = vmatpush1.bf16.msra.mxu1 %v2624_v37 }
 0x3f4   :  { %v2440_v46 = vpop.f32.mrb[16].mxu1 }
 0x3f5   :  { %v2441_v52 = vpop.f32.mrb[17].mxu1 }
 0x3f6   :  { %v2442_v53 = vadd.f32 %v2441_v52, %v2440_v46  ;;  %v2443_v54 = vpop.f32.mrb[18].mxu1 }
 0x3f7   :  { %v2444_v55 = vpop.f32.mrb[19].mxu1 }
 0x3f8   :  { %v1718_v57 = vadd.f32 %v2442_v53, %v1586_v51  ;;  %v2445_v59 = vadd.f32 %v2444_v55, %v2443_v54 }
 0x3fa   :  { %v1724_v61 = vadd.f32 %v1718_v57, %v1435_v56  ;;  %v1721_v62 = vadd.f32 %v2445_v59, %v1586_v51 }
 0x3fc   :  { %v1726_v63 = vpack.c.bf16 %v1724_v61, %v1724_v61  ;;  %v1725_v0 = vadd.f32 %v1721_v62, %v1438_v60 }
 0x3fe   :  { %v2008_v21 = vpack.c.bf16 %v1725_v0, %v1725_v0  ;;  %v1736_v2 = vrot.slane %v1726_v63, 1  ;;  %v1870_v49 = vrot.slane %v1726_v63, 2  ;;  %v1941_v11 = vrot.slane %v1726_v63, 3 }
 0x400   :  { %2263 = vmatmul.mubr.msk.bf16.vlgmr.msra.gmra.mrb[20].mxu0 %vm1757_vm4, %v1736_v2  ;;  %2283 = vmatmul.mubr.msk.bf16.vlgmr.msra.gmra.mrb[20].mxu1 %vm1757_vm4, %v2008_v21 }
 0x401   :  { %1826 = vmatpush1.bf16.msra.mxu0 %v2627_v1  ;;  %1857 = vmatprep.mubr.bf16.mxu0 %v2671_v58 }
 0x402   :  { %1827 = vmatprep.subr.bf16.mxu0 %v2632_v3 }
 0x405   :  { %1828 = vmatpush1.bf16.msra.mxu0 %v2630_v6 }
 0x406   :  { %1894 = vmatprep.subr.bf16.mxu0 %v2635_v12 }
 0x408   :  { %2268 = vmatmul.mubr.msk.bf16.vlgmr.msra.gmra.mrb[24].mxu0 %vm1757_vm4, %v1726_v63 }
 0x409   :  { %1895 = vmatpush1.bf16.msra.mxu0 %v2633_v4  ;;  %1926 = vmatprep.mubr.bf16.mxu0 %v2671_v58 }
 0x40a   :  { %1896 = vmatprep.subr.bf16.mxu0 %v2638_v5 }
 0x40d   :  { %1897 = vmatpush1.bf16.msra.mxu0 %v2636_v7 }
 0x40e   :  { %1965 = vmatprep.subr.bf16.mxu0 %v2641_v8 }
 0x410   :  { %2273 = vmatmul.mubr.msk.bf16.vlgmr.msra.gmra.mrb[28].mxu0 %vm1757_vm4, %v1870_v49 }
 0x411   :  { %1966 = vmatpush1.bf16.msra.mxu0 %v2639_v9  ;;  %1997 = vmatprep.mubr.bf16.mxu0 %v2671_v58 }
 0x412   :  { %1967 = vmatprep.subr.bf16.mxu0 %v2644_v10 }
 0x415   :  { %1968 = vmatpush1.bf16.msra.mxu0 %v2642_v48 }
 0x418   :  { %2278 = vmatmul.mubr.msk.bf16.vlgmr.msra.gmra.mrb[32].mxu0 %vm1757_vm4, %v1941_v11 }
 0x4d3   :  { %v1795_v13 = vpop.f32.mrb[20].mxu0  ;;  %v2070_v15 = vpop.f32.mrb[20].mxu1 }
 0x4d4   :  { %v1797_v50 = vpop.f32.mrb[21].mxu0  ;;  %v2072_v16 = vpop.f32.mrb[21].mxu1 }
 0x4d5   :  { %v1799_v17 = vpop.f32.mrb[22].mxu0  ;;  %v2074_v45 = vpop.f32.mrb[22].mxu1 }
 0x4d6   :  { %v1800_v14 = vpop.f32.mrb[23].mxu0  ;;  %v2075_v18 = vpop.f32.mrb[23].mxu1 }
 0x4db   :  { %v1859_v19 = vpop.f32.mrb[24].mxu0 }
 0x4dc   :  { %v1860_v20 = vadd.f32 %v1859_v19, %v1795_v13  ;;  %v1861_v22 = vpop.f32.mrb[25].mxu0 }
 0x4dd   :  { %v1862_v23 = vadd.f32 %v1861_v22, %v1797_v50  ;;  %v1863_v24 = vpop.f32.mrb[26].mxu0 }
 0x4de   :  { %v1864_v25 = vpop.f32.mrb[27].mxu0 }
 0x4e3   :  { %v1928_v58 = vpop.f32.mrb[28].mxu0 }
 0x4e4   :  { %v1935_v26 = vadd.f32 %v1928_v58, %v1860_v20  ;;  %v1930_v27 = vpop.f32.mrb[29].mxu0 }
 0x4e5   :  { %v1936_v28 = vadd.f32 %v1930_v27, %v1862_v23  ;;  %v1932_v29 = vpop.f32.mrb[30].mxu0 }
 0x4e6   :  { %v1933_v31 = vpop.f32.mrb[31].mxu0 }
 0x4eb   :  { %v1999_v35 = vpop.f32.mrb[32].mxu0 }
 0x4ec   :  { %v2006_v36 = vadd.f32 %v1999_v35, %v1935_v26  ;;  %v2001_v37 = vpop.f32.mrb[33].mxu0 }
 0x4ed   :  { %v2007_v39 = vadd.f32 %v2001_v37, %v1936_v28  ;;  %v2003_v40 = vpop.f32.mrb[34].mxu0 }
 0x4ee   :  { %v2077_v42 = vadd.f32 %v2070_v15, %v2006_v36  ;;  %v2004_v43 = vpop.f32.mrb[35].mxu0 }
 0x4ef   :  { %v2078_v44 = vadd.f32 %v2072_v16, %v2007_v39 }
 0x4f0   :  { %v2090_v46 = vadd.f32 %v2085_v38, %v2077_v42 }
 0x4f1   :  { %v2091_v51 = vadd.f32 %v2089_v41, %v2078_v44 }
 0x4f3   :  { %v2094_v52 = vcombine.low %v2090_v46, %v2091_v51 }
 0x4f5   :  { %2284 = vst.sshfl [vmem:[#allocation2] sm:$0x33 pattern:$0x76325410] %v2094_v52 }
 0x4f6   :  { %2656 = shalt.err (!%p2653_p4)
}
 0x4f7   :  { %s2657_s14 = scalar_lea.hbm %s3277_s3, 64 }
 0x4f8   :  { %p2658_p5 = scmp.ne.s32.totalorder %s3277_s3, %s2657_s14  ;;  %p2661_p6 = scmp.lt.u32.totalorder %s2657_s14, %s3277_s3 }
 0x4fa   :  { %p2663_p7 = pnand %p2661_p6, %p2658_p5 }
 0x4fc   :  { %2666 = shalt.err (!%p2663_p7)
}
 0x4fd   :  { %2113 = dma.vmem_to_hbm [thread:$0]  %s2111_s12, 64, %s3277_s3, [#allocation3]  }
 0x4fe   :  { %2667 = dma.done.wait [#allocation3], 64  }
 0x4ff   :  { %2668 = vsyncadd [#allocation3], 4294967232 }
 0x500   :  { %2117 = vsyncpa [#allocation3], 1 }

</bundles_post_ra>
